<compile_context>
chip_gen: v7x
topology: tpu7x:2x2x1
jax: 0.10.0
libtpu: 0.0.40
codegen_flags: <defaults>
</compile_context>

<pallas_src>
import functools

import jax
import jax.numpy as jnp
from jax import lax
from jax.experimental import pallas as pl
from jax.experimental.pallas import tpu as pltpu

INPUT_DIM = 12
H1 = 32
H2 = 16
OUTPUT_DIM = 5

_INV_SQRT2 = 0.7071067811865476


def _round_up(x, m):
    return ((x + m - 1) // m) * m


def _cdiv(a, b):
    return -(-a // b)


def _choose_block_m(batch, block_m):
    """Pick the batch tile (lane) width: multiple of 128, <= padded batch."""
    bm = max(128, min(_round_up(block_m, 128), _round_up(batch, 128)))
    # Keep ~>=4 grid steps when the batch allows it so the "parallel" axis can
    # shard across v7x's two TensorCores, but never shrink tiles below 256
    # rows (per-grid-step overhead ~0.35 us).
    four_way = _round_up(_cdiv(batch, 4), 128)
    if four_way >= 256:
        bm = min(bm, four_way)
    return bm


def _gelu_exact(x):
    # nn.GELU() default is the exact erf-based GELU.
    return 0.5 * x * (1.0 + lax.erf(x * _INV_SQRT2))


def _mlp_kernel(xT_ref, w1_ref, b1_ref, w2_ref, b2_ref, w3_ref, b3_ref, oT_ref):
    # xT_ref: (12, bm)   batch-in-lane tile
    xT = xT_ref[...].astype(jnp.float32)

    h = jnp.dot(w1_ref[...], xT, preferred_element_type=jnp.float32) + b1_ref[...]
    h = _gelu_exact(h)                                           # (32, bm)

    h = jnp.dot(w2_ref[...], h, preferred_element_type=jnp.float32) + b2_ref[...]
    h = _gelu_exact(h)                                           # (16, bm)

    y = jnp.dot(w3_ref[...], h, preferred_element_type=jnp.float32) + b3_ref[...]
    oT_ref[...] = y.astype(oT_ref.dtype)                         # (5, bm)


@functools.partial(jax.jit, static_argnames=("block_m",))
def lipschitz_nn_forward(x, params, *, block_m=512):
    """Fused MLP forward. x: (B, 12) float32 -> (B, 5) float32."""
    w1, b1, w2, b2, w3, b3 = params
    B, D = x.shape
    assert D == INPUT_DIM

    bm = _choose_block_m(B, block_m)
    Bp = _round_up(B, bm)

    # Single layout pass: transpose to batch-in-lane and pad the batch (lane)
    # axis up to a multiple of bm inside the same XLA copy. Zero padding keeps
    # the padded columns finite; they are sliced off below.
    xT = jnp.pad(x.astype(jnp.float32).T, ((0, 0), (0, Bp - B)))

    grid = (Bp // bm,)
    full = lambda shape: pl.BlockSpec(shape, lambda i: (0, 0))

    outT = pl.pallas_call(
        _mlp_kernel,
        out_shape=jax.ShapeDtypeStruct((OUTPUT_DIM, Bp), jnp.float32),
        grid_spec=pltpu.PrefetchScalarGridSpec(
            num_scalar_prefetch=0,
            grid=grid,
            in_specs=[
                pl.BlockSpec((INPUT_DIM, bm), lambda i: (0, i)),  # x^T tile
                full((H1, INPUT_DIM)),       # w1 (32, 12)
                full((H1, 1)),               # b1 (32, 1)
                full((H2, H1)),              # w2 (16, 32)
                full((H2, 1)),               # b2 (16, 1)
                full((OUTPUT_DIM, H2)),      # w3 (5, 16)
                full((OUTPUT_DIM, 1)),       # b3 (5, 1)
            ],
            out_specs=pl.BlockSpec((OUTPUT_DIM, bm), lambda i: (0, i)),
        ),
        compiler_params=pltpu.CompilerParams(
            dimension_semantics=("parallel",)
        ),
    )(xT, w1, b1, w2, b2, w3, b3)

    # Tiny output: slice off padded columns and restore (B, 5) layout.
    return outT[:, :B].T


def init_params(key):
    """Deterministic init mimicking PyTorch nn.Linear default
    (uniform(-1/sqrt(fan_in), 1/sqrt(fan_in))). Stored PyTorch-style:
    W: (out, in), b: (out, 1)."""
    def linear(key, fan_in, fan_out):
        kw, kb = jax.random.split(key)
        bound = 1.0 / float(fan_in) ** 0.5
        w = jax.random.uniform(kw, (fan_out, fan_in), jnp.float32, -bound, bound)
        b = jax.random.uniform(kb, (fan_out, 1), jnp.float32, -bound, bound)
        return w, b

    k1, k2, k3 = jax.random.split(key, 3)
    w1, b1 = linear(k1, INPUT_DIM, H1)
    w2, b2 = linear(k2, H1, H2)
    w3, b3 = linear(k3, H2, OUTPUT_DIM)
    return (w1, b1, w2, b2, w3, b3)


def reference_forward(x, params):
    """Pure-JAX reference for correctness check."""
    w1, b1, w2, b2, w3, b3 = params
    h = jax.nn.gelu(x @ w1.T + b1[:, 0], approximate=False)
    h = jax.nn.gelu(h @ w2.T + b2[:, 0], approximate=False)
    return h @ w3.T + b3[:, 0]


# TODO(synk): lip_loss requires autograd Jacobians (torch.autograd.grad); it is
# a training-time regularizer, not part of forward(), so it is not implemented.

if __name__ == "__main__":
    key = jax.random.PRNGKey(0)
    kx, kp = jax.random.split(key)

    # Small but non-trivial batch: not a multiple of 128 (exercises padding)
    # and large enough to produce a multi-step "parallel" grid.
    batch = 1000
    x = jax.random.normal(kx, (batch, INPUT_DIM), jnp.float32)
    params = init_params(kp)

    y = lipschitz_nn_forward(x, params)
    jax.block_until_ready(y)

    y_ref = reference_forward(x, params)
    assert y.shape == (batch, OUTPUT_DIM)
    assert jnp.allclose(y, y_ref, atol=1e-4, rtol=1e-4), (
        f"max abs err = {jnp.max(jnp.abs(y - y_ref))}"
    )

    print("KERNEL_OK")
</pallas_src>

<mosaic_0001>
module attributes {stable_mosaic.version = 11 : i64} {
  func.func @_mlp_kernel(%arg0: i32, %arg1: memref<12x256xf32, #tpu.memory_space<vmem>>, %arg2: memref<32x12xf32, #tpu.memory_space<vmem>>, %arg3: memref<32x1xf32, #tpu.memory_space<vmem>>, %arg4: memref<16x32xf32, #tpu.memory_space<vmem>>, %arg5: memref<16x1xf32, #tpu.memory_space<vmem>>, %arg6: memref<5x16xf32, #tpu.memory_space<vmem>>, %arg7: memref<5x1xf32, #tpu.memory_space<vmem>>, %arg8: memref<5x256xf32, #tpu.memory_space<vmem>>) attributes {dimension_semantics = [#tpu.dimension_semantics<parallel>], iteration_bounds = array<i64: 4>, scalar_prefetch = 0 : i64, scratch_operands = 0 : i64, tpu.core_type = #tpu.core_type<tc>, window_params = [{transform_indices = @transform_0, window_bounds = array<i64: 12, 256>}, {pipeline_mode = #tpu.pipeline_mode<synchronous>, transform_indices = @transform_1, window_bounds = array<i64: 32, 12>}, {pipeline_mode = #tpu.pipeline_mode<synchronous>, transform_indices = @transform_2, window_bounds = array<i64: 32, 1>}, {pipeline_mode = #tpu.pipeline_mode<synchronous>, transform_indices = @transform_3, window_bounds = array<i64: 16, 32>}, {pipeline_mode = #tpu.pipeline_mode<synchronous>, transform_indices = @transform_4, window_bounds = array<i64: 16, 1>}, {pipeline_mode = #tpu.pipeline_mode<synchronous>, transform_indices = @transform_5, window_bounds = array<i64: 5, 16>}, {pipeline_mode = #tpu.pipeline_mode<synchronous>, transform_indices = @transform_6, window_bounds = array<i64: 5, 1>}, {transform_indices = @transform_7, window_bounds = array<i64: 5, 256>}]} {
    %c0 = arith.constant 0 : index
    %c0_0 = arith.constant 0 : index
    %0 = vector.load %arg1[%c0, %c0_0] : memref<12x256xf32, #tpu.memory_space<vmem>>, vector<12x256xf32>
    %c0_1 = arith.constant 0 : index
    %c0_2 = arith.constant 0 : index
    %1 = vector.load %arg2[%c0_1, %c0_2] : memref<32x12xf32, #tpu.memory_space<vmem>>, vector<32x12xf32>
    %cst = arith.constant dense<0.000000e+00> : vector<32x256xf32>
    %2 = tpu.matmul %1, %0, %cst {dimension_numbers = #tpu.dot_dimension_numbers<[1], [0], [0], [1], [0, 0, 1, 1], [], []>} : vector<32x12xf32>, vector<12x256xf32>, vector<32x256xf32> -> vector<32x256xf32>
    %c0_3 = arith.constant 0 : index
    %c0_4 = arith.constant 0 : index
    %3 = vector.load %arg3[%c0_3, %c0_4] : memref<32x1xf32, #tpu.memory_space<vmem>>, vector<32x1xf32>
    %4 = vector.broadcast %3 : vector<32x1xf32> to vector<32x256xf32>
    %5 = arith.addf %2, %4 : vector<32x256xf32>
    %cst_5 = arith.constant 5.000000e-01 : f32
    %6 = vector.broadcast %cst_5 : f32 to vector<32x256xf32>
    %7 = arith.mulf %6, %5 : vector<32x256xf32>
    %cst_6 = arith.constant 0.707106769 : f32
    %8 = vector.broadcast %cst_6 : f32 to vector<32x256xf32>
    %9 = arith.mulf %5, %8 : vector<32x256xf32>
    %10 = math.erf %9 : vector<32x256xf32>
    %cst_7 = arith.constant 1.000000e+00 : f32
    %11 = vector.broadcast %cst_7 : f32 to vector<32x256xf32>
    %12 = arith.addf %11, %10 : vector<32x256xf32>
    %13 = arith.mulf %7, %12 : vector<32x256xf32>
    %c0_8 = arith.constant 0 : index
    %c0_9 = arith.constant 0 : index
    %14 = vector.load %arg4[%c0_8, %c0_9] : memref<16x32xf32, #tpu.memory_space<vmem>>, vector<16x32xf32>
    %cst_10 = arith.constant dense<0.000000e+00> : vector<16x256xf32>
    %15 = tpu.matmul %14, %13, %cst_10 {dimension_numbers = #tpu.dot_dimension_numbers<[1], [0], [0], [1], [0, 0, 1, 1], [], []>} : vector<16x32xf32>, vector<32x256xf32>, vector<16x256xf32> -> vector<16x256xf32>
    %c0_11 = arith.constant 0 : index
    %c0_12 = arith.constant 0 : index
    %16 = vector.load %arg5[%c0_11, %c0_12] : memref<16x1xf32, #tpu.memory_space<vmem>>, vector<16x1xf32>
    %17 = vector.broadcast %16 : vector<16x1xf32> to vector<16x256xf32>
    %18 = arith.addf %15, %17 : vector<16x256xf32>
    %cst_13 = arith.constant 5.000000e-01 : f32
    %19 = vector.broadcast %cst_13 : f32 to vector<16x256xf32>
    %20 = arith.mulf %19, %18 : vector<16x256xf32>
    %cst_14 = arith.constant 0.707106769 : f32
    %21 = vector.broadcast %cst_14 : f32 to vector<16x256xf32>
    %22 = arith.mulf %18, %21 : vector<16x256xf32>
    %23 = math.erf %22 : vector<16x256xf32>
    %cst_15 = arith.constant 1.000000e+00 : f32
    %24 = vector.broadcast %cst_15 : f32 to vector<16x256xf32>
    %25 = arith.addf %24, %23 : vector<16x256xf32>
    %26 = arith.mulf %20, %25 : vector<16x256xf32>
    %c0_16 = arith.constant 0 : index
    %c0_17 = arith.constant 0 : index
    %27 = vector.load %arg6[%c0_16, %c0_17] : memref<5x16xf32, #tpu.memory_space<vmem>>, vector<5x16xf32>
    %cst_18 = arith.constant dense<0.000000e+00> : vector<5x256xf32>
    %28 = tpu.matmul %27, %26, %cst_18 {dimension_numbers = #tpu.dot_dimension_numbers<[1], [0], [0], [1], [0, 0, 1, 1], [], []>} : vector<5x16xf32>, vector<16x256xf32>, vector<5x256xf32> -> vector<5x256xf32>
    %c0_19 = arith.constant 0 : index
    %c0_20 = arith.constant 0 : index
    %29 = vector.load %arg7[%c0_19, %c0_20] : memref<5x1xf32, #tpu.memory_space<vmem>>, vector<5x1xf32>
    %30 = vector.broadcast %29 : vector<5x1xf32> to vector<5x256xf32>
    %31 = arith.addf %28, %30 : vector<5x256xf32>
    %c0_21 = arith.constant 0 : index
    %c0_22 = arith.constant 0 : index
    %32 = vector.load %arg8[%c0_21, %c0_22] : memref<5x256xf32, #tpu.memory_space<vmem>>, vector<5x256xf32>
    tpu.vector_store %arg8[%c0_21, %c0_22], %31 {strides = array<i32>} : memref<5x256xf32, #tpu.memory_space<vmem>>, vector<5x256xf32>,
    return
  }
  func.func @transform_0(%arg0: i32) -> (i32, i32) {
    %c0_i32 = arith.constant 0 : i32
    %c0_i32_0 = arith.constant 0 : i32
    return %c0_i32, %arg0 : i32, i32
  }
  func.func @transform_1(%arg0: i32) -> (i32, i32) {
    %c0_i32 = arith.constant 0 : i32
    %c0_i32_0 = arith.constant 0 : i32
    %c0_i32_1 = arith.constant 0 : i32
    return %c0_i32, %c0_i32_0 : i32, i32
  }
  func.func @transform_2(%arg0: i32) -> (i32, i32) {
    %c0_i32 = arith.constant 0 : i32
    %c0_i32_0 = arith.constant 0 : i32
    %c0_i32_1 = arith.constant 0 : i32
    return %c0_i32, %c0_i32_0 : i32, i32
  }
  func.func @transform_3(%arg0: i32) -> (i32, i32) {
    %c0_i32 = arith.constant 0 : i32
    %c0_i32_0 = arith.constant 0 : i32
    %c0_i32_1 = arith.constant 0 : i32
    return %c0_i32, %c0_i32_0 : i32, i32
  }
  func.func @transform_4(%arg0: i32) -> (i32, i32) {
    %c0_i32 = arith.constant 0 : i32
    %c0_i32_0 = arith.constant 0 : i32
    %c0_i32_1 = arith.constant 0 : i32
    return %c0_i32, %c0_i32_0 : i32, i32
  }
  func.func @transform_5(%arg0: i32) -> (i32, i32) {
    %c0_i32 = arith.constant 0 : i32
    %c0_i32_0 = arith.constant 0 : i32
    %c0_i32_1 = arith.constant 0 : i32
    return %c0_i32, %c0_i32_0 : i32, i32
  }
  func.func @transform_6(%arg0: i32) -> (i32, i32) {
    %c0_i32 = arith.constant 0 : i32
    %c0_i32_0 = arith.constant 0 : i32
    %c0_i32_1 = arith.constant 0 : i32
    return %c0_i32, %c0_i32_0 : i32, i32
  }
  func.func @transform_7(%arg0: i32) -> (i32, i32) {
    %c0_i32 = arith.constant 0 : i32
    %c0_i32_0 = arith.constant 0 : i32
    return %c0_i32, %arg0 : i32, i32
  }
}

</mosaic_0001>

<bundles_post_ra>
// kernel: lipschitz_nn_forward.1
= control target key start
LH: loop header
LB: loop body
LE: loop exit
PB: predicated region body
PF: predicated region fallthrough
CT: control target
= control target key end

     0   :  { %s913_s24 = smov 0   ;;  %s915_s25 = smov 0   ;;  %s1026_s0 = inlined_call_operand.vmem [shape: f32[12,1024], index: 0, kind: input, shape index: {}]   ;;  %s1027_s1 = inlined_call_operand.vmem [shape: f32[32,12], index: 1, kind: input, shape index: {}]   ;;  %s1028_s2 = inlined_call_operand.vmem [shape: f32[32,1], index: 2, kind: input, shape index: {}]   ;;  %s1029_s3 = inlined_call_operand.vmem [shape: f32[16,32], index: 3, kind: input, shape index: {}]   ;;  %s1030_s4 = inlined_call_operand.vmem [shape: f32[16,1], index: 4, kind: input, shape index: {}]   ;;  %s1031_s5 = inlined_call_operand.vmem [shape: f32[5,16], index: 5, kind: input, shape index: {}]   ;;  %s1032_s6 = inlined_call_operand.vmem [shape: f32[5,1], index: 6, kind: input, shape index: {}]   ;;  %s1033_s7 = inlined_call_operand.vmem [shape: f32[5,1024], index: 7, kind: output, shape index: {}]  }
   0x1   :  { %s917_s26 = smov 0  }
   0x2 LB: > { %s752_s27 = sadd.s32 4294967295, %s868_s26   ;;  %s930_s28 = sadd.s32 1, %s868_s26   ;;  %s868_s26 = sphi %s917_s26, %s1038_s26   ;;  %s864_s25 = sphi %s915_s25, %s1037_s25   ;;  %s860_s24 = sphi %s913_s24, %s1036_s24  }
   0x3   : > { %s21_s29 = ssub.s32 %s868_s26, %s930_s28  ;;  %s24_s30 = sadd.s32 1, %s864_s25 }
   0x4   : > { %p22_p0 = scmp.eq.s32.totalorder %s21_s29, 0  ;;  %p31_p1 = scmp.ne.s32.totalorder %s864_s25, %s860_s24 }
   0x5   : > { %p32_p2 = scmp.eq.s32.totalorder %s868_s26, 0  ;;  %p755_p4 = scmp.ge.s32.totalorder %s868_s26, 4 }
   0x6   : > { %s939_s8 = scalar_select %p22_p0, %s864_s25, %s24_s30  }
   0x7   : > { %p33_p3 = por %p32_p2, %p31_p1  ;;  %227 = sbr.rel (%p755_p4) target bundleno = 21 (0x15), region = 40 }
   0xe   : > { %230 = sbr.rel (!%p33_p3) target bundleno = 21 (0x15), region = 44  ;;  %s232_s9 = sand.u32 (%p33_p3), 1, %s864_s25  }
   0xf   : > { %s774_s10 = sshll.u32 (%p33_p3), %s868_s26, 4  ;;  %s756_s11 = sshll.u32 (%p33_p3), %s232_s9, 5 }
  0x10   : > { %s237_s14 = scalar_lea.vmem (%p33_p3), %s1026_s0, %s774_s10  ;;  %s234_s15 = scalar_lea.vmem (%p33_p3), [#allocation2], %s756_s11 }
  0x11   : > { %v250_v0 = vld [vmem:[%s237_s14] sm:$0xff] (%p33_p3)  ;;  %v252_v1 = vld [vmem:[%s237_s14 + $0x8] sm:$0xff] (%p33_p3) }
  0x12   : > { %v254_v2 = vld [vmem:[%s237_s14 + $0x40] sm:$0xff] (%p33_p3)  ;;  %251 = vst [vmem:[%s234_s15] sm:$0xff] (%p33_p3), %v250_v0  ;;  %253 = vst [vmem:[%s234_s15 + $0x8] sm:$0xff] (%p33_p3), %v252_v1  ;;  %v256_v3 = vld [vmem:[%s237_s14 + $0x48] sm:$0xff] (%p33_p3) }
  0x13   : > { %255 = vst [vmem:[%s234_s15 + $0x10] sm:$0xff] (%p33_p3), %v254_v2  ;;  %257 = vst [vmem:[%s234_s15 + $0x18] sm:$0xff] (%p33_p3), %v256_v3 }
  0x15 PF: > { %p759_p5 = scmp.ge.s32.totalorder %s868_s26, 1  ;;  %p262_p6 = scmp.lt.s32.totalorder %s868_s26, 5 }
  0x17   : > { %p263_p7 = pnand %p759_p5, %p262_p6 }
  0x18   : > { %s269_s16 = sand.u32 (!%p263_p7), 1, %s860_s24   ;;  %vm352_vm0 = vcmask (!%p263_p7), 1043456   ;;  %v870_v4 = vmov (!%p263_p7), 0.0   ;;  %vm871_vm1 = vmmov (!%p263_p7), 1   ;;  %v872_v6 = vmov (!%p263_p7), 0   ;;  %v315_v7 = vld [vmem:[%s1028_s2] sm:$0xff] (!%p263_p7) }
  0x19   : > { %266 = sbr.rel (%p263_p7) target bundleno = 742 (0x2e6), region = 67  ;;  %s760_s17 = sshll.u32 (!%p263_p7), %s269_s16, 5  ;;  %423 = vmatprep.mubr.f32.mxu0 (!%p263_p7), %v870_v4  ;;  %573 = vmatprep.mubr.f32.mxu1 (!%p263_p7), %v870_v4  ;;  %vm952_vm2 = vmpackc.low (!%p263_p7), %vm352_vm0, %vm871_vm1  ;;  %v316_v13 = vld [vmem:[%s1028_s2 + $0x8] sm:$0xff] (!%p263_p7)  ;;  %v317_v14 = vld [vmem:[%s1028_s2 + $0x10] sm:$0xff] (!%p263_p7)  ;;  %vm339_vm3 = vcmask (!%p263_p7), 97280   ;;  %vm502_vm4 = vcmask (!%p263_p7), 261120  }
  0x1a   : > { %820 = vset.pattern.permute.xlu0 (!%p263_p7), %v872_v6  ;;  %821 = vset.pattern.permute.xlu1 (!%p263_p7), %v872_v6  ;;  %s271_s20 = scalar_lea.vmem (!%p263_p7), [#allocation2], %s760_s17  ;;  %v318_v16 = vld [vmem:[%s1028_s2 + $0x18] sm:$0xff] (!%p263_p7)  ;;  %v311_v17 = vld [vmem:[%s1027_s1] sm:$0xff] (!%p263_p7)  ;;  %v491_v19 = vld [vmem:[%s1030_s4 + $0x8] sm:$0xff] (!%p263_p7)  ;;  %vm613_vm5 = vcmask (!%p263_p7), 130048   ;;  %s761_s11 = sshll.u32 (!%p263_p7), %s752_s27, 1 }
  0x1b   : > { %v308_v8 = vld [vmem:[%s271_s20 + $0x8] sm:$0xff] (!%p263_p7)  ;;  %v310_v9 = vld [vmem:[%s271_s20 + $0x18] sm:$0xf] (!%p263_p7)  ;;  %v307_v10 = vld [vmem:[%s271_s20] sm:$0xff] (!%p263_p7)  ;;  %321 = vperm.xlu0 (!%p263_p7), %820, %v315_v7   ;;  %331 = vperm.xlu1 (!%p263_p7), %821, %v317_v14   ;;  %p302_p8 = scmp.lt.s32.totalorder (!%p263_p7), %s761_s11, 7 }
  0x1c   : > { %v775_v11 = vpack.c.bf16 (!%p263_p7), %v310_v9, %v308_v8  ;;  %v309_v12 = vld [vmem:[%s271_s20 + $0x10] sm:$0xf] (!%p263_p7)  ;;  %v490_v18 = vld [vmem:[%s1030_s4] sm:$0xff] (!%p263_p7)  ;;  %v312_v20 = vld [vmem:[%s1027_s1 + $0x8] sm:$0xff] (!%p263_p7) }
  0x1d   : > { %v778_v15 = vpack.c.bf16 (!%p263_p7), %v309_v12, %v307_v10  ;;  %v607_v21 = vld [vmem:[%s1032_s6] sm:$0x1f] (!%p263_p7)  ;;  %v313_v22 = vld [vmem:[%s1027_s1 + $0x10] sm:$0xff] (!%p263_p7)  ;;  %v314_v23 = vld [vmem:[%s1027_s1 + $0x18] sm:$0xff] (!%p263_p7) }
  0x1e   : > { %777 = vmatprep.subr.msk.bf16.mxu0 (!%p263_p7), %vm952_vm2, %v775_v11 }
  0x1f   : > { %780 = vmatpush1.bf16.msk.msra.mxu0 (!%p263_p7), %vm952_vm2, %v778_v15  ;;  %326 = vperm.xlu0 (!%p263_p7), %820, %v316_v13  }
  0x20   : > { %336 = vperm.xlu1 %821, %v318_v16   ;;  %s1040_s11 = smov (!%p302_p8, %s761_s11), 7 }
  0x21   : > { %s762_s12 = sshll.u32 %s1040_s11, 3 }
  0x22   : > { %765 = vmatmul.mubr.msk.f32.vlgmr.msra.gmra.mrb[0].mxu0 %vm339_vm3, %v311_v17  ;;  %s305_s15 = scalar_lea.vmem %s1033_s7, %s762_s12 }
  0x23   : > { %429 = vmatprep.mubr.f32.mxu0 %v870_v4  ;;  %494 = vperm.xlu0 %820, %v490_v18  }
  0x24   : > { %499 = vperm.xlu1 %821, %v491_v19  }
  0x26   : > { %766 = vmatmul.mubr.msk.f32.gmra.mrb[2].mxu0 %vm339_vm3, %v312_v20 }
  0x27   : > { %435 = vmatprep.mubr.f32.mxu0 %v870_v4  ;;  %610 = vperm.xlu0 %820, %v607_v21  }
  0x2a   : > { %767 = vmatmul.mubr.msk.f32.gmra.mrb[4].mxu0 %vm339_vm3, %v313_v22 }
  0x2b   : > { %441 = vmatprep.mubr.f32.mxu0 %v870_v4 }
  0x2e   : > { %768 = vmatmul.mubr.msk.f32.gmra.mrb[6].mxu0 %vm339_vm3, %v314_v23 }
  0x9a   : > { %v322_v24 = vpop.permute.xlu0 %321  ;;  %v332_v35 = vpop.permute.xlu1 %331 }
  0x9e   : > { %v327_v30 = vpop.permute.xlu0 %326 }
  0x9f   : > { %v337_v44 = vpop.permute.xlu1 %336 }
  0xf5   : > { %v425_v25 = vpop.f32.mrb[0].mxu0 }
  0xf6   : > { %v426_v26 = vadd.f32 %v425_v25, %v322_v24  ;;  %v427_v27 = vpop.f32.mrb[1].mxu0  ;;  %v488_v25 = vld [vmem:[%s1029_s3] sm:$0xff] }
  0xf7   : > { %v428_v28 = vadd.f32 %v427_v27, %v322_v24  ;;  %v495_v27 = vpop.permute.xlu0 %494 }
  0xf8   : > { %v456_v29 = vmul.f32 0.70710677, %v426_v26  ;;  %v448_v58 = vmul.f32 0.5, %v426_v26  ;;  %v489_v26 = vld [vmem:[%s1029_s3 + $0x8] sm:$0xff] }
  0xf9   : > { %v457_v31 = vmul.f32 0.70710677, %v428_v28  ;;  %v431_v32 = vpop.f32.mrb[2].mxu0  ;;  %v449_v61 = vmul.f32 0.5, %v428_v28 }
  0xfa   : > { %822 = verf.f32 %v456_v29  ;;  %v432_v33 = vadd.f32 %v431_v32, %v327_v30  ;;  %v433_v34 = vpop.f32.mrb[3].mxu0 }
  0xfb   : > { %824 = verf.f32 %v457_v31  ;;  %v434_v36 = vadd.f32 %v433_v34, %v327_v30 }
  0xfc   : > { %v458_v37 = vmul.f32 0.70710677, %v432_v33  ;;  %v450_v59 = vmul.f32 0.5, %v432_v33  ;;  %v500_v33 = vpop.permute.xlu1 %499 }
  0xfd   : > { %v459_v38 = vmul.f32 0.70710677, %v434_v36  ;;  %v437_v39 = vpop.f32.mrb[4].mxu0  ;;  %v451_v62 = vmul.f32 0.5, %v434_v36 }
  0xfe   : > { %826 = verf.f32 %v458_v37  ;;  %v438_v40 = vadd.f32 %v437_v39, %v332_v35  ;;  %v439_v41 = vpop.f32.mrb[5].mxu0 }
  0xff   : > { %828 = verf.f32 %v459_v38  ;;  %v440_v42 = vadd.f32 %v439_v41, %v332_v35 }
 0x100   : > { %v460_v43 = vmul.f32 0.70710677, %v438_v40  ;;  %v452_v13 = vmul.f32 0.5, %v438_v40 }
 0x101   : > { %v461_v45 = vmul.f32 0.70710677, %v440_v42  ;;  %v443_v46 = vpop.f32.mrb[6].mxu0  ;;  %v453_v16 = vmul.f32 0.5, %v440_v42 }
 0x102   : > { %830 = verf.f32 %v460_v43  ;;  %v444_v47 = vadd.f32 %v443_v46, %v337_v44  ;;  %v445_v48 = vpop.f32.mrb[7].mxu0 }
 0x103   : > { %832 = verf.f32 %v461_v45  ;;  %v446_v49 = vadd.f32 %v445_v48, %v337_v44 }
 0x104   : > { %v823_v50 = vpop.eup %822  ;;  %v462_v51 = vmul.f32 0.70710677, %v444_v47  ;;  %v454_v14 = vmul.f32 0.5, %v444_v47 }
 0x105   : > { %v825_v52 = vpop.eup %824  ;;  %v463_v53 = vmul.f32 0.70710677, %v446_v49  ;;  %v472_v54 = vadd.f32 1.0, %v823_v50  ;;  %v455_v17 = vmul.f32 0.5, %v446_v49 }
 0x106   : > { %834 = verf.f32 %v462_v51  ;;  %v473_v56 = vadd.f32 1.0, %v825_v52 }
 0x107   : > { %836 = verf.f32 %v463_v53  ;;  %v480_v0 = vmul.f32 %v472_v54, %v448_v58  ;;  %v606_v58 = vld [vmem:[%s1031_s5] sm:$0x1f] }
 0x108   : > { %v827_v55 = vpop.eup %826  ;;  %v481_v3 = vmul.f32 %v473_v56, %v449_v61 }
 0x109   : > { %v829_v57 = vpop.eup %828  ;;  %v474_v60 = vadd.f32 1.0, %v827_v55 }
 0x10a   : > { %v475_v63 = vadd.f32 1.0, %v829_v57 }
 0x10b   : > { %v482_v1 = vmul.f32 %v474_v60, %v450_v59  ;;  %v611_v59 = vpop.permute.xlu0 %610 }
 0x10c   : > { %v831_v2 = vpop.eup %830  ;;  %v483_v5 = vmul.f32 %v475_v63, %v451_v62 }
 0x10d   : > { %v833_v6 = vpop.eup %832  ;;  %v783_v7 = vpack.c.bf16 %v482_v1, %v480_v0  ;;  %v476_v9 = vadd.f32 1.0, %v831_v2 }
 0x10e   : > { %v781_v8 = vpack.c.bf16 %v483_v5, %v481_v3  ;;  %v477_v11 = vadd.f32 1.0, %v833_v6 }
 0x10f   : > { %v484_v19 = vmul.f32 %v476_v9, %v452_v13 }
 0x110   : > { %v835_v10 = vpop.eup %834  ;;  %782 = vmatprep.subr.bf16.mxu1 %v781_v8  ;;  %v485_v21 = vmul.f32 %v477_v11, %v453_v16 }
 0x111   : > { %v837_v12 = vpop.eup %836  ;;  %v478_v15 = vadd.f32 1.0, %v835_v10  ;;  %784 = vmatpush1.bf16.msra.mxu1 %v783_v7 }
 0x112   : > { %v479_v18 = vadd.f32 1.0, %v837_v12 }
 0x113   : > { %v486_v20 = vmul.f32 %v478_v15, %v454_v14 }
 0x114   : > { %v487_v22 = vmul.f32 %v479_v18, %v455_v17 }
 0x115   : > { %v787_v23 = vpack.c.bf16 %v486_v20, %v484_v19 }
 0x116   : > { %v785_v24 = vpack.c.bf16 %v487_v22, %v485_v21 }
 0x118   : > { %786 = vmatprep.subr.bf16.mxu1 %v785_v24 }
 0x119   : > { %788 = vmatpush1.bf16.msra.mxu1 %v787_v23 }
 0x11c   : > { %769 = vmatmul.mubr.msk.f32.vlgmr.msra.gmra.mrb[0].mxu1 %vm502_vm4, %v488_v25 }
 0x11d   : > { %579 = vmatprep.mubr.f32.mxu1 %v870_v4 }
 0x120   : > { %770 = vmatmul.mubr.msk.f32.gmra.mrb[2].mxu1 %vm502_vm4, %v489_v26 }
 0x121   : > { %681 = vmatprep.mubr.f32.mxu1 %v870_v4 }
 0x1ef   : > { %v575_v28 = vpop.f32.mrb[0].mxu1 }
 0x1f0   : > { %v576_v29 = vadd.f32 %v575_v28, %v495_v27  ;;  %v577_v30 = vpop.f32.mrb[1].mxu1 }
 0x1f1   : > { %v578_v31 = vadd.f32 %v577_v30, %v495_v27 }
 0x1f2   : > { %v590_v32 = vmul.f32 0.70710677, %v576_v29  ;;  %v586_v46 = vmul.f32 0.5, %v576_v29 }
 0x1f3   : > { %v591_v34 = vmul.f32 0.70710677, %v578_v31  ;;  %v581_v35 = vpop.f32.mrb[2].mxu1  ;;  %v587_v49 = vmul.f32 0.5, %v578_v31 }
 0x1f4   : > { %838 = verf.f32 %v590_v32  ;;  %v582_v36 = vadd.f32 %v581_v35, %v500_v33  ;;  %v583_v37 = vpop.f32.mrb[3].mxu1 }
 0x1f5   : > { %840 = verf.f32 %v591_v34  ;;  %v584_v38 = vadd.f32 %v583_v37, %v500_v33 }
 0x1f6   : > { %v592_v39 = vmul.f32 0.70710677, %v582_v36  ;;  %v588_v47 = vmul.f32 0.5, %v582_v36 }
 0x1f7   : > { %v593_v40 = vmul.f32 0.70710677, %v584_v38  ;;  %v589_v50 = vmul.f32 0.5, %v584_v38 }
 0x1f8   : > { %842 = verf.f32 %v592_v39 }
 0x1f9   : > { %844 = verf.f32 %v593_v40 }
 0x1fe   : > { %v839_v41 = vpop.eup %838 }
 0x1ff   : > { %v841_v4 = vpop.eup %840  ;;  %v598_v42 = vadd.f32 1.0, %v839_v41 }
 0x200   : > { %v599_v44 = vadd.f32 1.0, %v841_v4 }
 0x201   : > { %v602_v52 = vmul.f32 %v598_v42, %v586_v46 }
 0x202   : > { %v843_v43 = vpop.eup %842  ;;  %v603_v54 = vmul.f32 %v599_v44, %v587_v49 }
 0x203   : > { %v845_v45 = vpop.eup %844  ;;  %v600_v48 = vadd.f32 1.0, %v843_v43 }
 0x204   : > { %v601_v51 = vadd.f32 1.0, %v845_v45 }
 0x205   : > { %v604_v53 = vmul.f32 %v600_v48, %v588_v47 }
 0x206   : > { %v605_v55 = vmul.f32 %v601_v51, %v589_v50 }
 0x207   : > { %v791_v56 = vpack.c.bf16 %v604_v53, %v602_v52 }
 0x208   : > { %v789_v57 = vpack.c.bf16 %v605_v55, %v603_v54 }
 0x20a   : > { %790 = vmatprep.subr.bf16.mxu1 %v789_v57 }
 0x20b   : > { %792 = vmatpush1.bf16.msra.mxu1 %v791_v56 }
 0x20e   : > { %771 = vmatmul.mubr.msk.f32.vlgmr.msra.gmra.mrb[4].mxu1 %vm613_vm5, %v606_v58 }
 0x2e1   : > { %v683_v60 = vpop.f32.mrb[4].mxu1 }
 0x2e2   : > { %v684_v61 = vadd.f32 %v683_v60, %v611_v59  ;;  %v685_v62 = vpop.f32.mrb[5].mxu1 }
 0x2e3   : > { %v686_v63 = vadd.f32 %v685_v62, %v611_v59 }
 0x2e4   : > { %688 = vst [vmem:[%s305_s15] sm:$0x1f] %v684_v61 }
 0x2e5   : > { %689 = vst [vmem:[%s305_s15 + $0x8] sm:$0x1f] %v686_v63 }
 0x2e6 PF: > { %p14_p9 = scmp.ge.s32.totalorder %s930_s28, 6   ;;  %s1036_s24 = smov %s864_s25 }
 0x2e7   : > { %s1037_s25 = smov %s939_s8  ;;  %s1038_s26 = smov %s930_s28 }
 0x2e8   :  { %16 = sbr.rel (!%p14_p9) target bundleno = 2 (0x2), region = 106 }

</bundles_post_ra>
